<compile_context>
chip_gen: v5e
topology: v5e:2x2
jax: 0.10.0
libtpu: 0.0.40
codegen_flags: <defaults>
</compile_context>

<pallas_src>
import functools

import jax
import jax.numpy as jnp
from jax.experimental import pallas as pl
from jax.experimental.pallas import tpu as pltpu


def _mlp_kernel(n_layers, x_ref, *refs):
    """Fused MLP forward for one batch tile.

    x_ref : [B_tile, d_in]   natural batch-major block (compute dtype)
    refs  = (w0, b0, w1, b1, ..., w_{L-1}, b_{L-1}, out)
      w_j : [out_j, in_j]    PyTorch-native layout (compute dtype)
      b_j : [out_j, 1]       f32
      out : [d_out, B_tile]  f32, lane-dense
    """
    out_ref = refs[-1]
    param_refs = refs[:-1]

    # Tiny in-kernel transpose (XLU) -> [d_in, B_tile]; hidden under the x DMA.
    h = x_ref[...].T
    for j in range(n_layers):
        w = param_refs[2 * j][...]                 # [out_j, in_j]
        b = param_refs[2 * j + 1][...]             # [out_j, 1] f32
        # MXU matmul, f32 accumulation; bias broadcasts over lanes (batch).
        h = jnp.dot(w, h, preferred_element_type=jnp.float32) + b
        if j < n_layers - 1:
            h = jnp.maximum(h, 0.0)                # ReLU (hidden layers only)
            h = h.astype(w.dtype)                  # back to compute dtype for MXU
        # last layer: output_activation = Identity (no-op)
    out_ref[...] = h                               # f32 lane-dense store


def _round_up(x, m):
    return (x + m - 1) // m * m


def mlp_forward(x, weights, biases, *, batch_tile=None, max_batch_tile=2048,
                min_grid_steps=1, transpose_output=True):
    """Run the fused MLP Pallas kernel.

    x:        [B, sizes[0]]   (f32, or bf16 if it is already bf16 at rest)
    weights:  list of PyTorch-native [sizes[j+1], sizes[j]]  ([out, in])
    biases:   list of [sizes[j+1]]
    batch_tile:      rows per grid step (multiple of 128); None -> auto.
    max_batch_tile:  cap for the auto-picked tile.
    min_grid_steps:  set to 2 on v7x to shard the grid across both TCs.
    transpose_output: True -> [B, d_out] (PyTorch semantics);
                      False -> lane-dense [d_out, B] slab for fused consumers.
    """
    B, d_in = x.shape
    n_layers = len(weights)
    d_out = weights[-1].shape[0]
    compute_dtype = x.dtype          # no wrapper-side cast of x (review item 4)

    if batch_tile is None:
        batch_tile = min(_round_up(max(B, 1), 256), max_batch_tile)
        if min_grid_steps > 1:
            batch_tile = min(batch_tile,
                             max(256, _round_up(pl.cdiv(B, min_grid_steps), 256)))
    assert batch_tile % 128 == 0, "batch_tile must be a multiple of 128"

    n_tiles = pl.cdiv(B, batch_tile)
    b_pad = n_tiles * batch_tile
    # Pad only when needed (single cheap pass); padded rows are independent
    # columns in the kernel and are sliced off below.
    x_p = x if b_pad == B else jnp.pad(x, ((0, b_pad - B), (0, 0)))

    in_specs = [pl.BlockSpec((batch_tile, d_in), lambda i: (i, 0))]
    params = []
    for w, b in zip(weights, biases):
        w_c = w.astype(compute_dtype)                   # [out_j, in_j]
        b_c = b.reshape(-1, 1).astype(jnp.float32)      # [out_j, 1]
        # Full-array blocks at (0,0) every step, single-buffered -> resident
        # in VMEM with no extra pipeline buffer / per-step bookkeeping.
        in_specs.append(pl.BlockSpec(w_c.shape, lambda i: (0, 0),
                                     pipeline_mode=pl.Buffered(1)))
        in_specs.append(pl.BlockSpec(b_c.shape, lambda i: (0, 0),
                                     pipeline_mode=pl.Buffered(1)))
        params += [w_c, b_c]

    out_spec = pl.BlockSpec((d_out, batch_tile), lambda i: (0, i))

    flops = 2 * b_pad * sum(int(w.shape[0]) * int(w.shape[1]) for w in weights)
    bytes_accessed = (x_p.size * x_p.dtype.itemsize
                      + sum(p.size * p.dtype.itemsize for p in params)
                      + d_out * b_pad * 4)
    cost = pl.CostEstimate(flops=flops, transcendentals=0,
                           bytes_accessed=bytes_accessed)

    out_t = pl.pallas_call(
        functools.partial(_mlp_kernel, n_layers),
        out_shape=jax.ShapeDtypeStruct((d_out, b_pad), jnp.float32),
        grid=(n_tiles,),
        in_specs=in_specs,
        out_specs=out_spec,
        cost_estimate=cost,
        compiler_params=pltpu.CompilerParams(
            dimension_semantics=("parallel",)),
    )(x_p, *params)

    out = out_t[:, :B]                      # drop padded columns (lane slice)
    # Keep the lane-dense slab when the consumer can take it (review item 6).
    return out.T if transpose_output else out


def init_mlp_params(key, sizes):
    """Deterministic init mimicking PyTorch nn.Linear defaults
    (uniform(-1/sqrt(fan_in), 1/sqrt(fan_in))). Weights are PyTorch-native
    [out, in]."""
    weights, biases = [], []
    for j in range(len(sizes) - 1):
        fan_in, fan_out = sizes[j], sizes[j + 1]
        key, kw, kb = jax.random.split(key, 3)
        bound = 1.0 / (fan_in ** 0.5)
        w = jax.random.uniform(kw, (fan_out, fan_in), jnp.float32,
                               minval=-bound, maxval=bound)
        b = jax.random.uniform(kb, (fan_out,), jnp.float32,
                               minval=-bound, maxval=bound)
        weights.append(w)
        biases.append(b)
    return weights, biases


def mlp_reference(x, weights, biases):
    """Plain-JAX reference matching the PyTorch forward (weights [out, in])."""
    h = x
    n = len(weights)
    for j, (w, b) in enumerate(zip(weights, biases)):
        h = h @ w.T + b
        if j < n - 1:
            h = jnp.maximum(h, 0.0)
    return h


if __name__ == "__main__":
    key = jax.random.PRNGKey(0)

    # MLP(sizes=[16, 32, 32, 8], activation=nn.ReLU, output_activation=nn.Identity)
    sizes = [16, 32, 32, 8]
    batch = 512

    key, kx = jax.random.split(key)
    x = jax.random.normal(kx, (batch, sizes[0]), jnp.float32)
    weights, biases = init_mlp_params(key, sizes)
    ref = mlp_reference(x, weights, biases)

    # 1) Default path (auto tile covers the whole batch in one grid step),
    #    jitted so the (no-op here) producer fuses with surrounding ops.
    fwd = jax.jit(lambda xx: mlp_forward(xx, weights, biases))
    out = jax.block_until_ready(fwd(x))
    assert out.shape == (batch, sizes[-1])
    assert jnp.allclose(out, ref, atol=1e-5, rtol=1e-5), "f32 mismatch vs reference"

    # 2) Ragged batch: exercises the pad/slice path (300 -> one 512-wide tile).
    out_r = jax.block_until_ready(mlp_forward(x[:300], weights, biases))
    assert out_r.shape == (300, sizes[-1])
    assert jnp.allclose(out_r, ref[:300], atol=1e-5, rtol=1e-5), "ragged mismatch"

    # 3) Multi-step grid (e.g. v7x wants >=2 steps to use both TensorCores).
    out_m = jax.block_until_ready(
        mlp_forward(x, weights, biases, batch_tile=256))
    assert jnp.allclose(out_m, ref, atol=1e-5, rtol=1e-5), "multi-tile mismatch"

    # 4) Lane-dense output slab for fused consumers (e.g. DQN argmax).
    out_l = jax.block_until_ready(
        mlp_forward(x, weights, biases, transpose_output=False))
    assert out_l.shape == (sizes[-1], batch)
    assert jnp.allclose(out_l.T, ref, atol=1e-5, rtol=1e-5), "lane-major mismatch"

    print("KERNEL_OK")
</pallas_src>

<mosaic_0001>
module attributes {stable_mosaic.version = 11 : i64} {
  func.func @_mlp_kernel(%arg0: i32, %arg1: memref<512x16xf32, #tpu.memory_space<vmem>>, %arg2: memref<32x16xf32, #tpu.memory_space<vmem>>, %arg3: memref<32x1xf32, #tpu.memory_space<vmem>>, %arg4: memref<32x32xf32, #tpu.memory_space<vmem>>, %arg5: memref<32x1xf32, #tpu.memory_space<vmem>>, %arg6: memref<8x32xf32, #tpu.memory_space<vmem>>, %arg7: memref<8x1xf32, #tpu.memory_space<vmem>>, %arg8: memref<8x512xf32, #tpu.memory_space<vmem>>) attributes {dimension_semantics = [#tpu.dimension_semantics<parallel>], iteration_bounds = array<i64: 1>, scalar_prefetch = 0 : i64, scratch_operands = 0 : i64, tpu.core_type = #tpu.core_type<tc>, window_params = [{transform_indices = @transform_0, window_bounds = array<i64: 512, 16>}, {pipeline_mode = #tpu.pipeline_mode<synchronous>, transform_indices = @transform_1, window_bounds = array<i64: 32, 16>}, {pipeline_mode = #tpu.pipeline_mode<synchronous>, transform_indices = @transform_2, window_bounds = array<i64: 32, 1>}, {pipeline_mode = #tpu.pipeline_mode<synchronous>, transform_indices = @transform_3, window_bounds = array<i64: 32, 32>}, {pipeline_mode = #tpu.pipeline_mode<synchronous>, transform_indices = @transform_4, window_bounds = array<i64: 32, 1>}, {pipeline_mode = #tpu.pipeline_mode<synchronous>, transform_indices = @transform_5, window_bounds = array<i64: 8, 32>}, {pipeline_mode = #tpu.pipeline_mode<synchronous>, transform_indices = @transform_6, window_bounds = array<i64: 8, 1>}, {transform_indices = @transform_7, window_bounds = array<i64: 8, 512>}]} {
    %c0 = arith.constant 0 : index
    %c0_0 = arith.constant 0 : index
    %0 = vector.load %arg1[%c0, %c0_0] : memref<512x16xf32, #tpu.memory_space<vmem>>, vector<512x16xf32>
    %1 = tpu.transpose %0, [1, 0] : vector<512x16xf32> -> vector<16x512xf32>
    %c0_1 = arith.constant 0 : index
    %c0_2 = arith.constant 0 : index
    %2 = vector.load %arg2[%c0_1, %c0_2] : memref<32x16xf32, #tpu.memory_space<vmem>>, vector<32x16xf32>
    %c0_3 = arith.constant 0 : index
    %c0_4 = arith.constant 0 : index
    %3 = vector.load %arg3[%c0_3, %c0_4] : memref<32x1xf32, #tpu.memory_space<vmem>>, vector<32x1xf32>
    %cst = arith.constant dense<0.000000e+00> : vector<32x512xf32>
    %4 = tpu.matmul %2, %1, %cst {dimension_numbers = #tpu.dot_dimension_numbers<[1], [0], [0], [1], [0, 0, 1, 1], [], []>} : vector<32x16xf32>, vector<16x512xf32>, vector<32x512xf32> -> vector<32x512xf32>
    %5 = vector.broadcast %3 : vector<32x1xf32> to vector<32x512xf32>
    %6 = arith.addf %4, %5 : vector<32x512xf32>
    %cst_5 = arith.constant 0.000000e+00 : f32
    %7 = vector.broadcast %cst_5 : f32 to vector<32x512xf32>
    %8 = arith.maximumf %6, %7 : vector<32x512xf32>
    %c0_6 = arith.constant 0 : index
    %c0_7 = arith.constant 0 : index
    %9 = vector.load %arg4[%c0_6, %c0_7] : memref<32x32xf32, #tpu.memory_space<vmem>>, vector<32x32xf32>
    %c0_8 = arith.constant 0 : index
    %c0_9 = arith.constant 0 : index
    %10 = vector.load %arg5[%c0_8, %c0_9] : memref<32x1xf32, #tpu.memory_space<vmem>>, vector<32x1xf32>
    %cst_10 = arith.constant dense<0.000000e+00> : vector<32x512xf32>
    %11 = tpu.matmul %9, %8, %cst_10 {dimension_numbers = #tpu.dot_dimension_numbers<[1], [0], [0], [1], [0, 0, 1, 1], [], []>} : vector<32x32xf32>, vector<32x512xf32>, vector<32x512xf32> -> vector<32x512xf32>
    %12 = vector.broadcast %10 : vector<32x1xf32> to vector<32x512xf32>
    %13 = arith.addf %11, %12 : vector<32x512xf32>
    %cst_11 = arith.constant 0.000000e+00 : f32
    %14 = vector.broadcast %cst_11 : f32 to vector<32x512xf32>
    %15 = arith.maximumf %13, %14 : vector<32x512xf32>
    %c0_12 = arith.constant 0 : index
    %c0_13 = arith.constant 0 : index
    %16 = vector.load %arg6[%c0_12, %c0_13] : memref<8x32xf32, #tpu.memory_space<vmem>>, vector<8x32xf32>
    %c0_14 = arith.constant 0 : index
    %c0_15 = arith.constant 0 : index
    %17 = vector.load %arg7[%c0_14, %c0_15] : memref<8x1xf32, #tpu.memory_space<vmem>>, vector<8x1xf32>
    %cst_16 = arith.constant dense<0.000000e+00> : vector<8x512xf32>
    %18 = tpu.matmul %16, %15, %cst_16 {dimension_numbers = #tpu.dot_dimension_numbers<[1], [0], [0], [1], [0, 0, 1, 1], [], []>} : vector<8x32xf32>, vector<32x512xf32>, vector<8x512xf32> -> vector<8x512xf32>
    %19 = vector.broadcast %17 : vector<8x1xf32> to vector<8x512xf32>
    %20 = arith.addf %18, %19 : vector<8x512xf32>
    %c0_17 = arith.constant 0 : index
    %c0_18 = arith.constant 0 : index
    %21 = vector.load %arg8[%c0_17, %c0_18] : memref<8x512xf32, #tpu.memory_space<vmem>>, vector<8x512xf32>
    tpu.vector_store %arg8[%c0_17, %c0_18], %20 {strides = array<i32>} : memref<8x512xf32, #tpu.memory_space<vmem>>, vector<8x512xf32>,
    return
  }
  func.func @transform_0(%arg0: i32) -> (i32, i32) {
    %c0_i32 = arith.constant 0 : i32
    %c0_i32_0 = arith.constant 0 : i32
    return %arg0, %c0_i32 : i32, i32
  }
  func.func @transform_1(%arg0: i32) -> (i32, i32) {
    %c0_i32 = arith.constant 0 : i32
    %c0_i32_0 = arith.constant 0 : i32
    %c0_i32_1 = arith.constant 0 : i32
    return %c0_i32, %c0_i32_0 : i32, i32
  }
  func.func @transform_2(%arg0: i32) -> (i32, i32) {
    %c0_i32 = arith.constant 0 : i32
    %c0_i32_0 = arith.constant 0 : i32
    %c0_i32_1 = arith.constant 0 : i32
    return %c0_i32, %c0_i32_0 : i32, i32
  }
  func.func @transform_3(%arg0: i32) -> (i32, i32) {
    %c0_i32 = arith.constant 0 : i32
    %c0_i32_0 = arith.constant 0 : i32
    %c0_i32_1 = arith.constant 0 : i32
    return %c0_i32, %c0_i32_0 : i32, i32
  }
  func.func @transform_4(%arg0: i32) -> (i32, i32) {
    %c0_i32 = arith.constant 0 : i32
    %c0_i32_0 = arith.constant 0 : i32
    %c0_i32_1 = arith.constant 0 : i32
    return %c0_i32, %c0_i32_0 : i32, i32
  }
  func.func @transform_5(%arg0: i32) -> (i32, i32) {
    %c0_i32 = arith.constant 0 : i32
    %c0_i32_0 = arith.constant 0 : i32
    %c0_i32_1 = arith.constant 0 : i32
    return %c0_i32, %c0_i32_0 : i32, i32
  }
  func.func @transform_6(%arg0: i32) -> (i32, i32) {
    %c0_i32 = arith.constant 0 : i32
    %c0_i32_0 = arith.constant 0 : i32
    %c0_i32_1 = arith.constant 0 : i32
    return %c0_i32, %c0_i32_0 : i32, i32
  }
  func.func @transform_7(%arg0: i32) -> (i32, i32) {
    %c0_i32 = arith.constant 0 : i32
    %c0_i32_0 = arith.constant 0 : i32
    return %c0_i32, %arg0 : i32, i32
  }
}

</mosaic_0001>

<bundles_post_ra>
// kernel: _lambda_.1
= control target key start
LH: loop header
LB: loop body
LE: loop exit
PB: predicated region body
PF: predicated region fallthrough
CT: control target
= control target key end

     0   :  { %vm119_vm0 = vcmask 130048   ;;  %s1261_s0 = inlined_call_operand.vmem [shape: f32[512,16], index: 0, kind: input, shape index: {}]   ;;  %s1262_s1 = inlined_call_operand.vmem [shape: f32[32,16], index: 1, kind: input, shape index: {}]   ;;  %s1263_s2 = inlined_call_operand.vmem [shape: f32[32,1], index: 2, kind: input, shape index: {}]   ;;  %s1264_s3 = inlined_call_operand.vmem [shape: f32[32,32], index: 3, kind: input, shape index: {}]   ;;  %s1265_s4 = inlined_call_operand.vmem [shape: f32[32,1], index: 4, kind: input, shape index: {}]   ;;  %s1266_s5 = inlined_call_operand.vmem [shape: f32[8,32], index: 5, kind: input, shape index: {}]   ;;  %s1267_s6 = inlined_call_operand.vmem [shape: f32[8,1], index: 6, kind: input, shape index: {}]   ;;  %s1268_s7 = inlined_call_operand.hbm [shape: f32[8,512], index: 7, kind: output, shape index: {}]  }
   0x1   :  { %v42_v0 = vld [vmem:[%s1261_s0 + $0x78] sm:$0xff]  ;;  %v41_v4 = vld [vmem:[%s1261_s0 + $0x70] sm:$0xff]  ;;  %v40_v8 = vld [vmem:[%s1261_s0 + $0x68] sm:$0xff] }
   0x2   :  { %v58_v1 = vld [vmem:[%s1261_s0 + $0xf8] sm:$0xff]  ;;  %739 = vmatpush.xpose.msk.msra.mxu0 %vm119_vm0, %v42_v0  ;;  %v57_v5 = vld [vmem:[%s1261_s0 + $0xf0] sm:$0xff]  ;;  %v56_v9 = vld [vmem:[%s1261_s0 + $0xe8] sm:$0xff] }
   0x3   :  { %v74_v2 = vld [vmem:[%s1261_s0 + $0x178] sm:$0xff]  ;;  %759 = vmatpush.xpose.msk.msra.mxu1 %vm119_vm0, %v58_v1  ;;  %v73_v6 = vld [vmem:[%s1261_s0 + $0x170] sm:$0xff]  ;;  %v72_v10 = vld [vmem:[%s1261_s0 + $0x168] sm:$0xff] }
   0x4   :  { %v90_v3 = vld [vmem:[%s1261_s0 + $0x1f8] sm:$0xff]  ;;  %779 = vmatpush.xpose.msk.msra.mxu2 %vm119_vm0, %v74_v2  ;;  %v89_v7 = vld [vmem:[%s1261_s0 + $0x1f0] sm:$0xff]  ;;  %v88_v11 = vld [vmem:[%s1261_s0 + $0x1e8] sm:$0xff] }
   0x5   :  { %799 = vmatpush.xpose.msk.msra.mxu3 %vm119_vm0, %v90_v3  ;;  %v39_v12 = vld [vmem:[%s1261_s0 + $0x60] sm:$0xff]  ;;  %v38_v16 = vld [vmem:[%s1261_s0 + $0x58] sm:$0xff] }
   0x6   :  { %740 = vmatpush.xpose.msk.msra.mxu0 %vm119_vm0, %v41_v4  ;;  %v55_v13 = vld [vmem:[%s1261_s0 + $0xe0] sm:$0xff]  ;;  %v54_v17 = vld [vmem:[%s1261_s0 + $0xd8] sm:$0xff] }
   0x7   :  { %760 = vmatpush.xpose.msk.msra.mxu1 %vm119_vm0, %v57_v5  ;;  %v71_v14 = vld [vmem:[%s1261_s0 + $0x160] sm:$0xff]  ;;  %v70_v18 = vld [vmem:[%s1261_s0 + $0x158] sm:$0xff] }
   0x8   :  { %780 = vmatpush.xpose.msk.msra.mxu2 %vm119_vm0, %v73_v6  ;;  %v87_v15 = vld [vmem:[%s1261_s0 + $0x1e0] sm:$0xff]  ;;  %v86_v19 = vld [vmem:[%s1261_s0 + $0x1d8] sm:$0xff] }
   0x9   :  { %800 = vmatpush.xpose.msk.msra.mxu3 %vm119_vm0, %v89_v7 }
   0xa   :  { %741 = vmatpush.xpose.msk.msra.mxu0 %vm119_vm0, %v40_v8 }
   0xb   :  { %761 = vmatpush.xpose.msk.msra.mxu1 %vm119_vm0, %v56_v9 }
   0xc   :  { %781 = vmatpush.xpose.msk.msra.mxu2 %vm119_vm0, %v72_v10 }
   0xd   :  { %801 = vmatpush.xpose.msk.msra.mxu3 %vm119_vm0, %v88_v11 }
   0xe   :  { %742 = vmatpush.xpose.msk.msra.mxu0 %vm119_vm0, %v39_v12 }
   0xf   :  { %762 = vmatpush.xpose.msk.msra.mxu1 %vm119_vm0, %v55_v13 }
  0x10   :  { %782 = vmatpush.xpose.msk.msra.mxu2 %vm119_vm0, %v71_v14 }
  0x11   :  { %802 = vmatpush.xpose.msk.msra.mxu3 %vm119_vm0, %v87_v15 }
  0x12   :  { %12 = vsyncpa [#allocation3], 0  ;;  %743 = vmatpush.xpose.msk.msra.mxu0 %vm119_vm0, %v38_v16  ;;  %v37_v20 = vld [vmem:[%s1261_s0 + $0x50] sm:$0xff]  ;;  %v36_v24 = vld [vmem:[%s1261_s0 + $0x48] sm:$0xff]  ;;  %v870_v40 = vmov 0   ;;  %vm484_vm1 = vcmask 261120  }
  0x13   :  { %763 = vmatpush.xpose.msk.msra.mxu1 %vm119_vm0, %v54_v17  ;;  %v53_v21 = vld [vmem:[%s1261_s0 + $0xd0] sm:$0xff]  ;;  %v52_v25 = vld [vmem:[%s1261_s0 + $0xc8] sm:$0xff]  ;;  %v35_v28 = vld [vmem:[%s1261_s0 + $0x40] sm:$0xff]  ;;  %842 = vset.pattern.permute.xlu1 %v870_v40  ;;  %s730_s23 = sshll.u32 %s1268_s7, 4  ;;  %s731_s23 = int_to_ptr.hbm [resolvable:$true] %s730_s23 }
  0x14   :  { %783 = vmatpush.xpose.msk.msra.mxu2 %vm119_vm0, %v70_v18  ;;  %v69_v22 = vld [vmem:[%s1261_s0 + $0x150] sm:$0xff]  ;;  %v68_v26 = vld [vmem:[%s1261_s0 + $0x148] sm:$0xff]  ;;  %v51_v29 = vld [vmem:[%s1261_s0 + $0xc0] sm:$0xff]  ;;  %841 = vset.pattern.permute.xlu0 %v870_v40 }
  0x15   :  { %803 = vmatpush.xpose.msk.msra.mxu3 %vm119_vm0, %v86_v19  ;;  %v85_v23 = vld [vmem:[%s1261_s0 + $0x1d0] sm:$0xff]  ;;  %v84_v27 = vld [vmem:[%s1261_s0 + $0x1c8] sm:$0xff]  ;;  %v67_v30 = vld [vmem:[%s1261_s0 + $0x140] sm:$0xff]  ;;  %843 = vset.pattern.permute.xlu2 %v870_v40 }
  0x16   :  { %744 = vmatpush.xpose.msk.msra.mxu0 %vm119_vm0, %v37_v20  ;;  %v83_v31 = vld [vmem:[%s1261_s0 + $0x1c0] sm:$0xff]  ;;  %v34_v32 = vld [vmem:[%s1261_s0 + $0x38] sm:$0xff]  ;;  %v33_v36 = vld [vmem:[%s1261_s0 + $0x30] sm:$0xff] }
  0x17   :  { %764 = vmatpush.xpose.msk.msra.mxu1 %vm119_vm0, %v53_v21  ;;  %v50_v33 = vld [vmem:[%s1261_s0 + $0xb8] sm:$0xff]  ;;  %v49_v37 = vld [vmem:[%s1261_s0 + $0xb0] sm:$0xff]  ;;  %v32_v41 = vld [vmem:[%s1261_s0 + $0x28] sm:$0xff] }
  0x18   :  { %784 = vmatpush.xpose.msk.msra.mxu2 %vm119_vm0, %v69_v22  ;;  %v66_v34 = vld [vmem:[%s1261_s0 + $0x138] sm:$0xff]  ;;  %v65_v38 = vld [vmem:[%s1261_s0 + $0x130] sm:$0xff]  ;;  %v48_v42 = vld [vmem:[%s1261_s0 + $0xa8] sm:$0xff] }
  0x19   :  { %804 = vmatpush.xpose.msk.msra.mxu3 %vm119_vm0, %v85_v23  ;;  %v82_v35 = vld [vmem:[%s1261_s0 + $0x1b8] sm:$0xff]  ;;  %v81_v39 = vld [vmem:[%s1261_s0 + $0x1b0] sm:$0xff]  ;;  %v64_v43 = vld [vmem:[%s1261_s0 + $0x128] sm:$0xff] }
  0x1a   :  { %745 = vmatpush.xpose.msk.msra.mxu0 %vm119_vm0, %v36_v24  ;;  %v80_v44 = vld [vmem:[%s1261_s0 + $0x1a8] sm:$0xff]  ;;  %v31_v46 = vld [vmem:[%s1261_s0 + $0x20] sm:$0xff]  ;;  %v30_v50 = vld [vmem:[%s1261_s0 + $0x18] sm:$0xff] }
  0x1b   :  { %765 = vmatpush.xpose.msk.msra.mxu1 %vm119_vm0, %v52_v25  ;;  %v96_v45 = vld [vmem:[%s1263_s2 + $0x8] sm:$0xff]  ;;  %v47_v47 = vld [vmem:[%s1261_s0 + $0xa0] sm:$0xff]  ;;  %v46_v51 = vld [vmem:[%s1261_s0 + $0x98] sm:$0xff] }
  0x1c   :  { %785 = vmatpush.xpose.msk.msra.mxu2 %vm119_vm0, %v68_v26  ;;  %v63_v48 = vld [vmem:[%s1261_s0 + $0x120] sm:$0xff]  ;;  %106 = vperm.xlu1 %842, %v96_v45   ;;  %v62_v52 = vld [vmem:[%s1261_s0 + $0x118] sm:$0xff]  ;;  %v29_v56 = vld [vmem:[%s1261_s0 + $0x10] sm:$0xff] }
  0x1d   :  { %805 = vmatpush.xpose.msk.msra.mxu3 %vm119_vm0, %v84_v27  ;;  %v79_v49 = vld [vmem:[%s1261_s0 + $0x1a0] sm:$0xff]  ;;  %v78_v53 = vld [vmem:[%s1261_s0 + $0x198] sm:$0xff]  ;;  %v45_v57 = vld [vmem:[%s1261_s0 + $0x90] sm:$0xff] }
  0x1e   :  { %746 = vmatpush.xpose.msk.msra.mxu0 %vm119_vm0, %v35_v28  ;;  %v95_v54 = vld [vmem:[%s1263_s2] sm:$0xff]  ;;  %v98_v55 = vld [vmem:[%s1263_s2 + $0x18] sm:$0xff]  ;;  %v61_v58 = vld [vmem:[%s1261_s0 + $0x110] sm:$0xff] }
  0x1f   :  { %766 = vmatpush.xpose.msk.msra.mxu1 %vm119_vm0, %v51_v29  ;;  %v77_v59 = vld [vmem:[%s1261_s0 + $0x190] sm:$0xff]  ;;  %116 = vperm.xlu0 %841, %v98_v55   ;;  %v28_v60 = vld [vmem:[%s1261_s0 + $0x8] sm:$0xff]  ;;  %v460_v1 = vld [vmem:[%s1265_s4] sm:$0xff] }
  0x20   :  { %786 = vmatpush.xpose.msk.msra.mxu2 %vm119_vm0, %v67_v30  ;;  %v44_v61 = vld [vmem:[%s1261_s0 + $0x88] sm:$0xff]  ;;  %v97_v0 = vld [vmem:[%s1263_s2 + $0x10] sm:$0xff]  ;;  %v27_v2 = vld [vmem:[%s1261_s0] sm:$0xff] }
  0x21   :  { %806 = vmatpush.xpose.msk.msra.mxu3 %vm119_vm0, %v83_v31  ;;  %v60_v62 = vld [vmem:[%s1261_s0 + $0x108] sm:$0xff]  ;;  %v43_v3 = vld [vmem:[%s1261_s0 + $0x80] sm:$0xff]  ;;  %v93_v9 = vld [vmem:[%s1262_s1 + $0x10] sm:$0xff] }
  0x22   :  { %747 = vmatpush.xpose.msk.msra.mxu0 %vm119_vm0, %v34_v32  ;;  %v76_v63 = vld [vmem:[%s1261_s0 + $0x188] sm:$0xff]  ;;  %v59_v4 = vld [vmem:[%s1261_s0 + $0x100] sm:$0xff]  ;;  %v94_v10 = vld [vmem:[%s1262_s1 + $0x18] sm:$0xff] }
  0x23   :  { %767 = vmatpush.xpose.msk.msra.mxu1 %vm119_vm0, %v50_v33  ;;  %v75_v5 = vld [vmem:[%s1261_s0 + $0x180] sm:$0xff]  ;;  %v461_v7 = vld [vmem:[%s1265_s4 + $0x8] sm:$0xff] }
  0x24   :  { %787 = vmatpush.xpose.msk.msra.mxu2 %vm119_vm0, %v66_v34  ;;  %101 = vperm.xlu1 %842, %v95_v54   ;;  %v91_v6 = vld [vmem:[%s1262_s1] sm:$0xff]  ;;  %v92_v8 = vld [vmem:[%s1262_s1 + $0x8] sm:$0xff] }
  0x25   :  { %807 = vmatpush.xpose.msk.msra.mxu3 %vm119_vm0, %v82_v35  ;;  %v456_v55 = vld [vmem:[%s1264_s3] sm:$0xff] }
  0x26   :  { %748 = vmatpush.xpose.msk.msra.mxu0 %vm119_vm0, %v33_v36 }
  0x27   :  { %768 = vmatpush.xpose.msk.msra.mxu1 %vm119_vm0, %v49_v37  ;;  %111 = vperm.xlu0 %841, %v97_v0  }
  0x28   :  { %788 = vmatpush.xpose.msk.msra.mxu2 %vm119_vm0, %v65_v38 }
  0x29   :  { %808 = vmatpush.xpose.msk.msra.mxu3 %vm119_vm0, %v81_v39 }
  0x2a   :  { %749 = vmatpush.xpose.msk.msra.mxu0 %vm119_vm0, %v32_v41 }
  0x2b   :  { %769 = vmatpush.xpose.msk.msra.mxu1 %vm119_vm0, %v48_v42 }
  0x2c   :  { %789 = vmatpush.xpose.msk.msra.mxu2 %vm119_vm0, %v64_v43  ;;  %466 = vperm.xlu1 %842, %v460_v1   ;;  %v457_v1 = vld [vmem:[%s1264_s3 + $0x8] sm:$0xff] }
  0x2d   :  { %809 = vmatpush.xpose.msk.msra.mxu3 %vm119_vm0, %v80_v44 }
  0x2e   :  { %750 = vmatpush.xpose.msk.msra.mxu0 %vm119_vm0, %v31_v46 }
  0x2f   :  { %770 = vmatpush.xpose.msk.msra.mxu1 %vm119_vm0, %v47_v47  ;;  %471 = vperm.xlu0 %841, %v461_v7  }
  0x30   :  { %790 = vmatpush.xpose.msk.msra.mxu2 %vm119_vm0, %v63_v48 }
  0x31   :  { %810 = vmatpush.xpose.msk.msra.mxu3 %vm119_vm0, %v79_v49 }
  0x32   :  { %751 = vmatpush.xpose.msk.msra.mxu0 %vm119_vm0, %v30_v50 }
  0x33   :  { %771 = vmatpush.xpose.msk.msra.mxu1 %vm119_vm0, %v46_v51 }
  0x34   :  { %791 = vmatpush.xpose.msk.msra.mxu2 %vm119_vm0, %v62_v52 }
  0x35   :  { %811 = vmatpush.xpose.msk.msra.mxu3 %vm119_vm0, %v78_v53 }
  0x36   :  { %752 = vmatpush.xpose.msk.msra.mxu0 %vm119_vm0, %v29_v56 }
  0x37   :  { %772 = vmatpush.xpose.msk.msra.mxu1 %vm119_vm0, %v45_v57 }
  0x38   :  { %792 = vmatpush.xpose.msk.msra.mxu2 %vm119_vm0, %v61_v58 }
  0x39   :  { %812 = vmatpush.xpose.msk.msra.mxu3 %vm119_vm0, %v77_v59 }
  0x3a   :  { %753 = vmatpush.xpose.msk.msra.mxu0 %vm119_vm0, %v28_v60  ;;  %v463_v60 = vld [vmem:[%s1265_s4 + $0x18] sm:$0xff] }
  0x3b   :  { %773 = vmatpush.xpose.msk.msra.mxu1 %vm119_vm0, %v44_v61  ;;  %481 = vperm.xlu2 %843, %v463_v60  }
  0x3c   :  { %793 = vmatpush.xpose.msk.msra.mxu2 %vm119_vm0, %v60_v62 }
  0x3d   :  { %813 = vmatpush.xpose.msk.msra.mxu3 %vm119_vm0, %v76_v63 }
  0x3e   :  { %754 = vmatpush.xpose.msk.msra.mxu0 %vm119_vm0, %v27_v2  ;;  %v462_v2 = vld [vmem:[%s1265_s4 + $0x10] sm:$0xff] }
  0x3f   :  { %774 = vmatpush.xpose.msk.msra.mxu1 %vm119_vm0, %v43_v3  ;;  %v458_v3 = vld [vmem:[%s1264_s3 + $0x10] sm:$0xff] }
  0x40   :  { %794 = vmatpush.xpose.msk.msra.mxu2 %vm119_vm0, %v59_v4  ;;  %v630_v4 = vld [vmem:[%s1267_s6] sm:$0xff] }
  0x41   :  { %814 = vmatpush.xpose.msk.msra.mxu3 %vm119_vm0, %v75_v5  ;;  %755 = vmatmul.msk.f32.vlgmr.msra.gmra.mxu0 %vm119_vm0, %v91_v6  ;;  %v459_v5 = vld [vmem:[%s1264_s3 + $0x18] sm:$0xff] }
  0x42   :  { %775 = vmatmul.msk.f32.vlgmr.msra.gmra.mxu1 %vm119_vm0, %v91_v6 }
  0x43   :  { %795 = vmatmul.msk.f32.vlgmr.msra.gmra.mxu2 %vm119_vm0, %v91_v6  ;;  %476 = vperm.xlu2 %843, %v462_v2  }
  0x44   :  { %815 = vmatmul.msk.f32.vlgmr.msra.gmra.mxu3 %vm119_vm0, %v91_v6 }
  0x49   :  { %756 = vmatmul.msk.f32.gmra.mxu0 %vm119_vm0, %v92_v8 }
  0x4a   :  { %776 = vmatmul.msk.f32.gmra.mxu1 %vm119_vm0, %v92_v8 }
  0x4b   :  { %796 = vmatmul.msk.f32.gmra.mxu2 %vm119_vm0, %v92_v8  ;;  %633 = vperm.xlu2 %843, %v630_v4  }
  0x4c   :  { %816 = vmatmul.msk.f32.gmra.mxu3 %vm119_vm0, %v92_v8 }
  0x51   :  { %757 = vmatmul.msk.f32.gmra.mxu0 %vm119_vm0, %v93_v9 }
  0x52   :  { %777 = vmatmul.msk.f32.gmra.mxu1 %vm119_vm0, %v93_v9 }
  0x53   :  { %797 = vmatmul.msk.f32.gmra.mxu2 %vm119_vm0, %v93_v9 }
  0x54   :  { %817 = vmatmul.msk.f32.gmra.mxu3 %vm119_vm0, %v93_v9 }
  0x59   :  { %758 = vmatmul.msk.f32.gmra.mxu0 %vm119_vm0, %v94_v10 }
  0x5a   :  { %778 = vmatmul.msk.f32.gmra.mxu1 %vm119_vm0, %v94_v10 }
  0x5b   :  { %798 = vmatmul.msk.f32.gmra.mxu2 %vm119_vm0, %v94_v10 }
  0x5c   :  { %818 = vmatmul.msk.f32.gmra.mxu3 %vm119_vm0, %v94_v10 }
  0x8e   :  { %v107_v22 = vpop.permute.xlu1 %106 }
  0x91   :  { %v117_v17 = vpop.permute.xlu0 %116 }
  0x95   :  { %v482_v10 = vpop.permute.xlu2 %481 }
  0x96   :  { %v102_v36 = vpop.permute.xlu1 %101 }
  0x99   :  { %v112_v23 = vpop.permute.xlu0 %111 }
  0xbe   :  { %v341_v11 = vpop.f32.mrf.mxu0 }
  0xbf   :  { %v370_v12 = vpop.f32.mrf.mxu1  ;;  %v342_v39 = vadd.f32 %v341_v11, %v102_v36 }
  0xc0   :  { %v371_v40 = vadd.f32 %v370_v12, %v102_v36 }
  0xc1   :  { %v440_v49 = vmax.f32 %v342_v39, 0.0 }
  0xc2   :  { %v441_v50 = vmax.f32 %v371_v40, 0.0  ;;  %v629_v40 = vld [vmem:[%s1266_s5] sm:$0xff]  ;;  %s871_s5 = smov [#allocation2]  }
  0xc3   :  { %s728_s21 = sshll.u32 %s871_s5, 4  ;;  %s729_s21 = int_to_ptr.vmem [resolvable:$true] %s728_s21 }
  0xc6   :  { %v399_v13 = vpop.f32.mrf.mxu2  ;;  %v344_v15 = vpop.f32.mrf.mxu0 }
  0xc7   :  { %v428_v14 = vpop.f32.mrf.mxu3  ;;  %v373_v16 = vpop.f32.mrf.mxu1  ;;  %v345_v32 = vadd.f32 %v344_v15, %v107_v22  ;;  %v400_v56 = vadd.f32 %v399_v13, %v102_v36 }
  0xc8   :  { %v374_v33 = vadd.f32 %v373_v16, %v107_v22  ;;  %v429_v57 = vadd.f32 %v428_v14, %v102_v36 }
  0xc9   :  { %v444_v41 = vmax.f32 %v345_v32, 0.0  ;;  %v442_v63 = vmax.f32 %v400_v56, 0.0 }
  0xca   :  { %v445_v42 = vmax.f32 %v374_v33, 0.0  ;;  %v443_v0 = vmax.f32 %v429_v57, 0.0 }
  0xce   :  { %v402_v18 = vpop.f32.mrf.mxu2  ;;  %v347_v20 = vpop.f32.mrf.mxu0 }
  0xcf   :  { %v431_v19 = vpop.f32.mrf.mxu3  ;;  %v376_v21 = vpop.f32.mrf.mxu1  ;;  %v348_v28 = vadd.f32 %v347_v20, %v112_v23  ;;  %v403_v51 = vadd.f32 %v402_v18, %v107_v22 }
  0xd0   :  { %v377_v29 = vadd.f32 %v376_v21, %v112_v23  ;;  %v432_v52 = vadd.f32 %v431_v19, %v107_v22  ;;  %v472_v22 = vpop.permute.xlu0 %471 }
  0xd1   :  { %v448_v37 = vmax.f32 %v348_v28, 0.0  ;;  %v446_v61 = vmax.f32 %v403_v51, 0.0 }
  0xd2   :  { %v449_v38 = vmax.f32 %v377_v29, 0.0  ;;  %v447_v62 = vmax.f32 %v432_v52, 0.0 }
  0xd6   :  { %v405_v24 = vpop.f32.mrf.mxu2  ;;  %v350_v26 = vpop.f32.mrf.mxu0 }
  0xd7   :  { %v434_v25 = vpop.f32.mrf.mxu3  ;;  %v379_v27 = vpop.f32.mrf.mxu1  ;;  %v351_v30 = vadd.f32 %v350_v26, %v117_v17  ;;  %v406_v45 = vadd.f32 %v405_v24, %v112_v23 }
  0xd8   :  { %v380_v31 = vadd.f32 %v379_v27, %v117_v17  ;;  %v435_v46 = vadd.f32 %v434_v25, %v112_v23  ;;  %v467_v27 = vpop.permute.xlu1 %466 }
  0xd9   :  { %v452_v34 = vmax.f32 %v351_v30, 0.0  ;;  %v450_v58 = vmax.f32 %v406_v45, 0.0 }
  0xda   :  { %v453_v35 = vmax.f32 %v380_v31, 0.0  ;;  %v451_v59 = vmax.f32 %v435_v46, 0.0 }
  0xdb   :  { %509 = vmatpush.msrb.mxu0 %v452_v34 }
  0xdc   :  { %538 = vmatpush.msrb.mxu1 %v453_v35 }
  0xdd   :  { %510 = vmatpush.msrb.mxu0 %v448_v37 }
  0xde   :  { %v408_v43 = vpop.f32.mrf.mxu2  ;;  %539 = vmatpush.msrb.mxu1 %v449_v38 }
  0xdf   :  { %v437_v44 = vpop.f32.mrf.mxu3  ;;  %v409_v47 = vadd.f32 %v408_v43, %v117_v17  ;;  %511 = vmatpush.msrb.mxu0 %v444_v41 }
  0xe0   :  { %v438_v48 = vadd.f32 %v437_v44, %v117_v17  ;;  %540 = vmatpush.msrb.mxu1 %v445_v42  ;;  %v477_v17 = vpop.permute.xlu2 %476 }
  0xe1   :  { %v454_v53 = vmax.f32 %v409_v47, 0.0  ;;  %512 = vmatpush.msrb.mxu0 %v440_v49 }
  0xe2   :  { %v455_v54 = vmax.f32 %v438_v48, 0.0  ;;  %541 = vmatpush.msrb.mxu1 %v441_v50  ;;  %819 = vmatmul.msk.f32.vlgmr.msrb.gmra.mxu0 %vm484_vm1, %v456_v55 }
  0xe3   :  { %567 = vmatpush.msrb.mxu2 %v454_v53  ;;  %823 = vmatmul.msk.f32.vlgmr.msrb.gmra.mxu1 %vm484_vm1, %v456_v55 }
  0xe4   :  { %596 = vmatpush.msrb.mxu3 %v455_v54 }
  0xe5   :  { %568 = vmatpush.msrb.mxu2 %v450_v58 }
  0xe6   :  { %597 = vmatpush.msrb.mxu3 %v451_v59 }
  0xe7   :  { %569 = vmatpush.msrb.mxu2 %v446_v61 }
  0xe8   :  { %598 = vmatpush.msrb.mxu3 %v447_v62  ;;  %v634_v59 = vpop.permute.xlu2 %633 }
  0xe9   :  { %570 = vmatpush.msrb.mxu2 %v442_v63 }
  0xea   :  { %599 = vmatpush.msrb.mxu3 %v443_v0  ;;  %827 = vmatmul.msk.f32.vlgmr.msrb.gmra.mxu2 %vm484_vm1, %v456_v55 }
  0xeb   :  { %831 = vmatmul.msk.f32.vlgmr.msrb.gmra.mxu3 %vm484_vm1, %v456_v55  ;;  %820 = vmatmul.msk.f32.gmra.mxu0 %vm484_vm1, %v457_v1 }
  0xec   :  { %824 = vmatmul.msk.f32.gmra.mxu1 %vm484_vm1, %v457_v1 }
  0xf2   :  { %828 = vmatmul.msk.f32.gmra.mxu2 %vm484_vm1, %v457_v1 }
  0xf3   :  { %832 = vmatmul.msk.f32.gmra.mxu3 %vm484_vm1, %v457_v1  ;;  %821 = vmatmul.msk.f32.gmra.mxu0 %vm484_vm1, %v458_v3 }
  0xf4   :  { %825 = vmatmul.msk.f32.gmra.mxu1 %vm484_vm1, %v458_v3 }
  0xfa   :  { %829 = vmatmul.msk.f32.gmra.mxu2 %vm484_vm1, %v458_v3 }
  0xfb   :  { %833 = vmatmul.msk.f32.gmra.mxu3 %vm484_vm1, %v458_v3  ;;  %822 = vmatmul.msk.f32.gmra.mxu0 %vm484_vm1, %v459_v5 }
  0xfc   :  { %826 = vmatmul.msk.f32.gmra.mxu1 %vm484_vm1, %v459_v5 }
 0x102   :  { %830 = vmatmul.msk.f32.gmra.mxu2 %vm484_vm1, %v459_v5 }
 0x103   :  { %834 = vmatmul.msk.f32.gmra.mxu3 %vm484_vm1, %v459_v5 }
 0x15f   :  { %v514_v6 = vpop.f32.mrf.mxu0 }
 0x160   :  { %v543_v7 = vpop.f32.mrf.mxu1  ;;  %v515_v34 = vadd.f32 %v514_v6, %v467_v27 }
 0x161   :  { %v544_v35 = vadd.f32 %v543_v7, %v467_v27 }
 0x162   :  { %v613_v38 = vmax.f32 %v515_v34, 0.0 }
 0x163   :  { %v614_v39 = vmax.f32 %v544_v35, 0.0 }
 0x168   :  { %v517_v8 = vpop.f32.mrf.mxu0 }
 0x169   :  { %v546_v9 = vpop.f32.mrf.mxu1  ;;  %v518_v25 = vadd.f32 %v517_v8, %v472_v22 }
 0x16a   :  { %v547_v26 = vadd.f32 %v546_v9, %v472_v22 }
 0x16b   :  { %v617_v36 = vmax.f32 %v518_v25, 0.0 }
 0x16c   :  { %v618_v37 = vmax.f32 %v547_v26, 0.0 }
 0x16d   :  { %v572_v11 = vpop.f32.mrf.mxu2 }
 0x16e   :  { %v601_v12 = vpop.f32.mrf.mxu3  ;;  %v573_v51 = vadd.f32 %v572_v11, %v467_v27 }
 0x16f   :  { %v602_v52 = vadd.f32 %v601_v12, %v467_v27 }
 0x170   :  { %v520_v13 = vpop.f32.mrf.mxu0  ;;  %v615_v57 = vmax.f32 %v573_v51, 0.0 }
 0x171   :  { %v549_v14 = vpop.f32.mrf.mxu1  ;;  %v521_v18 = vadd.f32 %v520_v13, %v477_v17  ;;  %v616_v58 = vmax.f32 %v602_v52, 0.0 }
 0x172   :  { %v550_v19 = vadd.f32 %v549_v14, %v477_v17 }
 0x173   :  { %v621_v30 = vmax.f32 %v521_v18, 0.0 }
 0x174   :  { %v622_v31 = vmax.f32 %v550_v19, 0.0 }
 0x175   :  { %v575_v15 = vpop.f32.mrf.mxu2 }
 0x176   :  { %v604_v16 = vpop.f32.mrf.mxu3  ;;  %v576_v47 = vadd.f32 %v575_v15, %v472_v22 }
 0x177   :  { %v605_v48 = vadd.f32 %v604_v16, %v472_v22 }
 0x178   :  { %v523_v20 = vpop.f32.mrf.mxu0  ;;  %v619_v55 = vmax.f32 %v576_v47, 0.0 }
 0x179   :  { %v552_v21 = vpop.f32.mrf.mxu1  ;;  %v524_v23 = vadd.f32 %v523_v20, %v482_v10  ;;  %v620_v56 = vmax.f32 %v605_v48, 0.0 }
 0x17a   :  { %v553_v24 = vadd.f32 %v552_v21, %v482_v10 }
 0x17b   :  { %v625_v28 = vmax.f32 %v524_v23, 0.0 }
 0x17c   :  { %v626_v29 = vmax.f32 %v553_v24, 0.0 }
 0x17d   :  { %v578_v32 = vpop.f32.mrf.mxu2  ;;  %651 = vmatpush.msra.mxu0 %v625_v28 }
 0x17e   :  { %v607_v33 = vpop.f32.mrf.mxu3  ;;  %671 = vmatpush.msra.mxu1 %v626_v29  ;;  %v579_v43 = vadd.f32 %v578_v32, %v477_v17 }
 0x17f   :  { %652 = vmatpush.msra.mxu0 %v621_v30  ;;  %v608_v44 = vadd.f32 %v607_v33, %v477_v17 }
 0x180   :  { %672 = vmatpush.msra.mxu1 %v622_v31  ;;  %v623_v53 = vmax.f32 %v579_v43, 0.0 }
 0x181   :  { %653 = vmatpush.msra.mxu0 %v617_v36  ;;  %v624_v54 = vmax.f32 %v608_v44, 0.0 }
 0x182   :  { %673 = vmatpush.msra.mxu1 %v618_v37 }
 0x183   :  { %654 = vmatpush.msra.mxu0 %v613_v38 }
 0x184   :  { %674 = vmatpush.msra.mxu1 %v614_v39  ;;  %835 = vmatmul.msk.f32.vlgmr.msra.gmra.mxu0 %vm484_vm1, %v629_v40 }
 0x185   :  { %v581_v41 = vpop.f32.mrf.mxu2  ;;  %836 = vmatmul.msk.f32.vlgmr.msra.gmra.mxu1 %vm484_vm1, %v629_v40 }
 0x186   :  { %v610_v42 = vpop.f32.mrf.mxu3  ;;  %v582_v45 = vadd.f32 %v581_v41, %v482_v10 }
 0x187   :  { %v611_v46 = vadd.f32 %v610_v42, %v482_v10 }
 0x188   :  { %v627_v49 = vmax.f32 %v582_v45, 0.0 }
 0x189   :  { %v628_v50 = vmax.f32 %v611_v46, 0.0 }
 0x18a   :  { %691 = vmatpush.msra.mxu2 %v627_v49 }
 0x18b   :  { %711 = vmatpush.msra.mxu3 %v628_v50 }
 0x18c   :  { %692 = vmatpush.msra.mxu2 %v623_v53 }
 0x18d   :  { %712 = vmatpush.msra.mxu3 %v624_v54 }
 0x18e   :  { %693 = vmatpush.msra.mxu2 %v619_v55 }
 0x18f   :  { %713 = vmatpush.msra.mxu3 %v620_v56 }
 0x190   :  { %694 = vmatpush.msra.mxu2 %v615_v57 }
 0x191   :  { %714 = vmatpush.msra.mxu3 %v616_v58  ;;  %837 = vmatmul.msk.f32.vlgmr.msra.gmra.mxu2 %vm484_vm1, %v629_v40 }
 0x192   :  { %838 = vmatmul.msk.f32.vlgmr.msra.gmra.mxu3 %vm484_vm1, %v629_v40 }
 0x201   :  { %v656_v60 = vpop.f32.mrf.mxu0 }
 0x202   :  { %v676_v61 = vpop.f32.mrf.mxu1  ;;  %v657_v62 = vadd.f32 %v656_v60, %v634_v59 }
 0x203   :  { %v677_v63 = vadd.f32 %v676_v61, %v634_v59 }
 0x204   :  { %719 = vst [vmem:[#allocation2] sm:$0xff] %v657_v62 }
 0x205   :  { %720 = vst [vmem:[#allocation2 + $0x8] sm:$0xff] %v677_v63 }
 0x214   :  { %v696_v0 = vpop.f32.mrf.mxu2 }
 0x215   :  { %v716_v1 = vpop.f32.mrf.mxu3  ;;  %v697_v2 = vadd.f32 %v696_v0, %v634_v59 }
 0x216   :  { %v717_v3 = vadd.f32 %v716_v1, %v634_v59 }
 0x217   :  { %721 = vst [vmem:[#allocation2 + $0x10] sm:$0xff] %v697_v2 }
 0x218   :  { %722 = vst [vmem:[#allocation2 + $0x18] sm:$0xff] %v717_v3 }
 0x219   :  { %733 = dma.vmem_to_hbm [thread:$0]  %s729_s21, 512, %s731_s23, [#allocation3]  }
 0x21a   :  { %868 = dma.done.wait [#allocation3], 512  }
 0x21b   :  { %869 = vsyncadd [#allocation3], 4294966784 }
 0x21c   :  { %738 = vsyncpa [#allocation3], 1 }

</bundles_post_ra>
